<compile_context>
chip_gen: v7x
topology: tpu7x:2x2x1
jax: 0.10.0
libtpu: 0.0.40
codegen_flags: <defaults>
</compile_context>

<pallas_src>
import functools

import jax
import jax.numpy as jnp
from jax.experimental import pallas as pl
from jax.experimental.pallas import tpu as pltpu

_MIB = 1024 * 1024


def _round_up(x, m):
    return -(-x // m) * m


# ---------------------------------------------------------------------------
# Kernels
# ---------------------------------------------------------------------------
def _ffn_resident_kernel(x_ref, w1_ref, b1_ref, w2_ref, b2_ref, o_ref):
    # x_ref:  (tm, d_model)   x.dtype (cast to bf16 here: single HBM read of x)
    # w1_ref: (d_model, d_ffw) bf16   -- VMEM-resident (constant index_map)
    # b1_ref: (1, d_ffw)       f32
    # w2_ref: (d_ffw, d_model) bf16   -- VMEM-resident (constant index_map)
    # b2_ref: (1, d_model)     f32
    # o_ref:  (tm, d_model)    x.dtype
    x = x_ref[...].astype(w1_ref.dtype)
    h = jnp.dot(x, w1_ref[...], preferred_element_type=jnp.float32)
    h = jnp.maximum(h + b1_ref[...], 0.0)
    # TODO(synk): dropout1 is identity (eval mode); training-mode dropout would
    # build a mask via pltpu.prng_seed / pltpu.prng_random_bits here.
    out = jnp.dot(h.astype(w2_ref.dtype), w2_ref[...],
                  preferred_element_type=jnp.float32)
    o_ref[...] = (out + b2_ref[...]).astype(o_ref.dtype)


def _ffn_streamed_kernel(x_ref, w1_ref, b1_ref, w2_ref, b2_ref, o_ref, acc_ref):
    # Fallback path: d_ffw is tiled (reduction axis, last in the grid).
    # x_ref:   (tm, d_model)   x.dtype
    # w1_ref:  (d_model, tk)   bf16
    # b1_ref:  (1, tk)         f32
    # w2_ref:  (tk, d_model)   bf16
    # b2_ref:  (1, d_model)    f32
    # o_ref:   (tm, d_model)   x.dtype
    # acc_ref: (tm, d_model)   f32 scratch accumulator
    k = pl.program_id(1)

    @pl.when(k == 0)
    def _init():
        # Fold b2 directly into the accumulator init (no zero-fill + add pass).
        acc_ref[...] = jnp.broadcast_to(b2_ref[...], acc_ref.shape)

    x = x_ref[...].astype(w1_ref.dtype)
    h = jnp.dot(x, w1_ref[...], preferred_element_type=jnp.float32)
    h = jnp.maximum(h + b1_ref[...], 0.0)
    acc_ref[...] += jnp.dot(h.astype(w2_ref.dtype), w2_ref[...],
                            preferred_element_type=jnp.float32)

    @pl.when(k == pl.num_programs(1) - 1)
    def _finalize():
        o_ref[...] = acc_ref[...].astype(o_ref.dtype)


# ---------------------------------------------------------------------------
# Wrapper
# ---------------------------------------------------------------------------
def _pick_tk(d_ffw, tk_max):
    """Largest 128-multiple <= tk_max dividing d_ffw (rounded up to x128)."""
    d_ffw_p = _round_up(d_ffw, 128)
    tk = 128
    for cand in (256, 512, 1024, 2048, 4096):
        if cand <= tk_max and d_ffw_p % cand == 0:
            tk = cand
    return tk, d_ffw_p


@functools.partial(jax.jit, static_argnames=("tm", "tk_max"))
def pointwise_ffn(x, w1_t, b1, w2_t, b2, *, tm=256, tk_max=2048):
    """x: (batch, seq, d_model) -> (batch, seq, d_model).

    w1_t: (d_model, d_ffw), b1: (d_ffw,), w2_t: (d_ffw, d_model), b2: (d_model,)
    (weights pre-transposed relative to PyTorch's (out, in) layout).
    """
    batch, seq, d_model = x.shape
    d_ffw = w1_t.shape[1]
    n_tok = batch * seq
    x_itemsize = jnp.dtype(x.dtype).itemsize

    # x stays in its original dtype (no wrapper-side bf16 copy, no jnp.pad):
    # it is read from HBM exactly once and cast to bf16 inside the kernel.
    x2d = x.reshape(n_tok, d_model)
    w1b = w1_t.astype(jnp.bfloat16)
    w2b = w2_t.astype(jnp.bfloat16)
    b1f = b1.astype(jnp.float32).reshape(1, d_ffw)
    b2f = b2.astype(jnp.float32).reshape(1, d_model)

    # Token tile: multiple of 16 (bf16 sublane packing); ragged last tile is a
    # Pallas partial block (garbage rows only affect masked / sliced-off rows).
    tm_eff = min(tm, _round_up(n_tok, 16))

    # -------------------- resident-weights path --------------------
    weight_bytes = 2 * (2 * d_model * d_ffw)                  # W1 + W2 in bf16
    resident_est = (weight_bytes
                    + 2 * tm_eff * d_model * x_itemsize       # x tile (x2 buf)
                    + 2 * tm_eff * d_model * x_itemsize       # out tile (x2 buf)
                    + tm_eff * d_ffw * 4                      # h intermediate
                    + 2 * _MIB)                               # misc/biases
    use_resident = resident_est <= 48 * _MIB                  # safe under v7x 64 MiB

    if use_resident:
        n_tiles = pl.cdiv(n_tok, tm_eff)   # >=2 / even preferred for v7x megacore
        vmem_limit = int(min(max(resident_est + 8 * _MIB, 32 * _MIB), 64 * _MIB))
        out2d = pl.pallas_call(
            _ffn_resident_kernel,
            out_shape=jax.ShapeDtypeStruct((n_tok, d_model), x.dtype),
            grid_spec=pltpu.PrefetchScalarGridSpec(
                num_scalar_prefetch=0,
                grid=(n_tiles,),
                in_specs=[
                    pl.BlockSpec((tm_eff, d_model), lambda i: (i, 0)),   # x tile
                    # Constant index maps -> W1/W2/b1/b2 are DMA'd once and
                    # stay VMEM-resident for every token tile.
                    pl.BlockSpec((d_model, d_ffw), lambda i: (0, 0)),    # W1^T
                    pl.BlockSpec((1, d_ffw), lambda i: (0, 0)),          # b1
                    pl.BlockSpec((d_ffw, d_model), lambda i: (0, 0)),    # W2^T
                    pl.BlockSpec((1, d_model), lambda i: (0, 0)),        # b2
                ],
                out_specs=pl.BlockSpec((tm_eff, d_model), lambda i: (i, 0)),
            ),
            compiler_params=pltpu.CompilerParams(
                dimension_semantics=("parallel",),
                vmem_limit_bytes=vmem_limit,
            ),
        )(x2d, w1b, b1f, w2b, b2f)
        return out2d.reshape(batch, seq, d_model)

    # -------------------- streamed-weights fallback --------------------
    # Larger token tiles raise arithmetic intensity when weights must be
    # re-streamed per token tile (v6e wants >=512; pair with moderate tk).
    tm_s = min(max(tm, 512), _round_up(n_tok, 16))
    tk, d_ffw_p = _pick_tk(d_ffw, tk_max)
    if d_ffw_p != d_ffw:
        # Rare: d_ffw not a multiple of 128.  Keep the three pads coupled:
        # zero W1 columns + zero b1 (relu(0)=0) + zero W2 rows contribute 0.
        pad = d_ffw_p - d_ffw
        w1b = jnp.pad(w1b, ((0, 0), (0, pad)))
        b1f = jnp.pad(b1f, ((0, 0), (0, pad)))
        w2b = jnp.pad(w2b, ((0, pad), (0, 0)))

    grid = (pl.cdiv(n_tok, tm_s), d_ffw_p // tk)
    streamed_est = (3 * (2 * d_model * tk * 2)                 # W1/W2 slices, 3-buf
                    + 2 * tm_s * d_model * x_itemsize          # x tile (x2 buf)
                    + 2 * tm_s * d_model * x_itemsize          # out tile (x2 buf)
                    + tm_s * d_model * 4                       # f32 accumulator
                    + tm_s * tk * 4                            # h intermediate
                    + 2 * _MIB)
    vmem_limit = int(min(max(streamed_est + 8 * _MIB, 32 * _MIB), 64 * _MIB))

    out2d = pl.pallas_call(
        _ffn_streamed_kernel,
        out_shape=jax.ShapeDtypeStruct((n_tok, d_model), x.dtype),
        grid_spec=pltpu.PrefetchScalarGridSpec(
            num_scalar_prefetch=0,
            grid=grid,
            in_specs=[
                pl.BlockSpec((tm_s, d_model), lambda i, k: (i, 0)),      # x tile
                pl.BlockSpec((d_model, tk), lambda i, k: (0, k),
                             pipeline_mode=pl.Buffered(3)),              # W1^T slice
                pl.BlockSpec((1, tk), lambda i, k: (0, k)),              # b1 slice
                pl.BlockSpec((tk, d_model), lambda i, k: (k, 0),
                             pipeline_mode=pl.Buffered(3)),              # W2^T slice
                pl.BlockSpec((1, d_model), lambda i, k: (0, 0)),         # b2
            ],
            out_specs=pl.BlockSpec((tm_s, d_model), lambda i, k: (i, 0)),
            scratch_shapes=[pltpu.VMEM((tm_s, d_model), jnp.float32)],
        ),
        compiler_params=pltpu.CompilerParams(
            dimension_semantics=("parallel", "arbitrary"),
            vmem_limit_bytes=vmem_limit,
        ),
    )(x2d, w1b, b1f, w2b, b2f)
    return out2d.reshape(batch, seq, d_model)


# ---------------------------------------------------------------------------
# Reference (mirrors the kernel's mixed precision: bf16 MXU operands, f32 acc)
# ---------------------------------------------------------------------------
def _reference(x, w1_t, b1, w2_t, b2):
    xb = x.astype(jnp.bfloat16)
    w1b = w1_t.astype(jnp.bfloat16)
    w2b = w2_t.astype(jnp.bfloat16)
    h = jnp.dot(xb, w1b, preferred_element_type=jnp.float32) + b1
    h = jnp.maximum(h, 0.0)
    out = jnp.dot(h.astype(jnp.bfloat16), w2b,
                  preferred_element_type=jnp.float32) + b2
    return out.astype(x.dtype)


if __name__ == "__main__":
    # Small deterministic shapes consistent with the module's forward.
    batch, seq = 2, 8
    d_model, d_ffw = 32, 64
    dropout_rate = 0.1  # identity at inference

    key = jax.random.PRNGKey(0)
    kx, kw1, kb1, kw2, kb2 = jax.random.split(key, 5)

    x = jax.random.normal(kx, (batch, seq, d_model), dtype=jnp.float32)

    # Deterministic parameter init (PyTorch-style uniform bounds), stored
    # already transposed relative to PyTorch's (out, in) layout.
    bound1 = 1.0 / (d_model ** 0.5)
    bound2 = 1.0 / (d_ffw ** 0.5)
    w1_t = jax.random.uniform(kw1, (d_model, d_ffw), minval=-bound1, maxval=bound1)
    b1 = jax.random.uniform(kb1, (d_ffw,), minval=-bound1, maxval=bound1)
    w2_t = jax.random.uniform(kw2, (d_ffw, d_model), minval=-bound2, maxval=bound2)
    b2 = jax.random.uniform(kb2, (d_model,), minval=-bound2, maxval=bound2)

    out = pointwise_ffn(x, w1_t, b1, w2_t, b2)
    out = jax.block_until_ready(out)

    ref = _reference(x, w1_t, b1, w2_t, b2)
    assert out.shape == (batch, seq, d_model)
    assert jnp.allclose(out, ref, atol=1e-2, rtol=1e-2), "mismatch vs reference"

    print("KERNEL_OK")
</pallas_src>

<mosaic_0001>
module attributes {stable_mosaic.version = 11 : i64} {
  func.func @_ffn_resident_kernel(%arg0: i32, %arg1: memref<16x32xf32, #tpu.memory_space<vmem>>, %arg2: memref<32x64xbf16, #tpu.memory_space<vmem>>, %arg3: memref<1x64xf32, #tpu.memory_space<vmem>>, %arg4: memref<64x32xbf16, #tpu.memory_space<vmem>>, %arg5: memref<1x32xf32, #tpu.memory_space<vmem>>, %arg6: memref<16x32xf32, #tpu.memory_space<vmem>>) attributes {dimension_semantics = [#tpu.dimension_semantics<parallel>], iteration_bounds = array<i64: 1>, scalar_prefetch = 0 : i64, scratch_operands = 0 : i64, tpu.core_type = #tpu.core_type<tc>, window_params = [{transform_indices = @transform_0, window_bounds = array<i64: 16, 32>}, {pipeline_mode = #tpu.pipeline_mode<synchronous>, transform_indices = @transform_1, window_bounds = array<i64: 32, 64>}, {pipeline_mode = #tpu.pipeline_mode<synchronous>, transform_indices = @transform_2, window_bounds = array<i64: 1, 64>}, {pipeline_mode = #tpu.pipeline_mode<synchronous>, transform_indices = @transform_3, window_bounds = array<i64: 64, 32>}, {pipeline_mode = #tpu.pipeline_mode<synchronous>, transform_indices = @transform_4, window_bounds = array<i64: 1, 32>}, {transform_indices = @transform_5, window_bounds = array<i64: 16, 32>}]} {
    %c0 = arith.constant 0 : index
    %c0_0 = arith.constant 0 : index
    %0 = vector.load %arg1[%c0, %c0_0] : memref<16x32xf32, #tpu.memory_space<vmem>>, vector<16x32xf32>
    %1 = arith.truncf %0 : vector<16x32xf32> to vector<16x32xbf16>
    %c0_1 = arith.constant 0 : index
    %c0_2 = arith.constant 0 : index
    %2 = vector.load %arg2[%c0_1, %c0_2] : memref<32x64xbf16, #tpu.memory_space<vmem>>, vector<32x64xbf16>
    %cst = arith.constant dense<0.000000e+00> : vector<16x64xf32>
    %3 = tpu.matmul %1, %2, %cst {dimension_numbers = #tpu.dot_dimension_numbers<[1], [0], [0], [1], [0, 0, 1, 1], [], []>} : vector<16x32xbf16>, vector<32x64xbf16>, vector<16x64xf32> -> vector<16x64xf32>
    %c0_3 = arith.constant 0 : index
    %c0_4 = arith.constant 0 : index
    %4 = vector.load %arg3[%c0_3, %c0_4] : memref<1x64xf32, #tpu.memory_space<vmem>>, vector<1x64xf32>
    %5 = vector.broadcast %4 : vector<1x64xf32> to vector<16x64xf32>
    %6 = arith.addf %3, %5 : vector<16x64xf32>
    %cst_5 = arith.constant 0.000000e+00 : f32
    %7 = vector.broadcast %cst_5 : f32 to vector<16x64xf32>
    %8 = arith.maximumf %6, %7 : vector<16x64xf32>
    %9 = arith.truncf %8 : vector<16x64xf32> to vector<16x64xbf16>
    %c0_6 = arith.constant 0 : index
    %c0_7 = arith.constant 0 : index
    %10 = vector.load %arg4[%c0_6, %c0_7] : memref<64x32xbf16, #tpu.memory_space<vmem>>, vector<64x32xbf16>
    %cst_8 = arith.constant dense<0.000000e+00> : vector<16x32xf32>
    %11 = tpu.matmul %9, %10, %cst_8 {dimension_numbers = #tpu.dot_dimension_numbers<[1], [0], [0], [1], [0, 0, 1, 1], [], []>} : vector<16x64xbf16>, vector<64x32xbf16>, vector<16x32xf32> -> vector<16x32xf32>
    %c0_9 = arith.constant 0 : index
    %c0_10 = arith.constant 0 : index
    %12 = vector.load %arg5[%c0_9, %c0_10] : memref<1x32xf32, #tpu.memory_space<vmem>>, vector<1x32xf32>
    %13 = vector.broadcast %12 : vector<1x32xf32> to vector<16x32xf32>
    %14 = arith.addf %11, %13 : vector<16x32xf32>
    %c0_11 = arith.constant 0 : index
    %c0_12 = arith.constant 0 : index
    %15 = vector.load %arg6[%c0_11, %c0_12] : memref<16x32xf32, #tpu.memory_space<vmem>>, vector<16x32xf32>
    tpu.vector_store %arg6[%c0_11, %c0_12], %14 {strides = array<i32>} : memref<16x32xf32, #tpu.memory_space<vmem>>, vector<16x32xf32>,
    return
  }
  func.func @transform_0(%arg0: i32) -> (i32, i32) {
    %c0_i32 = arith.constant 0 : i32
    %c0_i32_0 = arith.constant 0 : i32
    return %arg0, %c0_i32 : i32, i32
  }
  func.func @transform_1(%arg0: i32) -> (i32, i32) {
    %c0_i32 = arith.constant 0 : i32
    %c0_i32_0 = arith.constant 0 : i32
    %c0_i32_1 = arith.constant 0 : i32
    return %c0_i32, %c0_i32_0 : i32, i32
  }
  func.func @transform_2(%arg0: i32) -> (i32, i32) {
    %c0_i32 = arith.constant 0 : i32
    %c0_i32_0 = arith.constant 0 : i32
    %c0_i32_1 = arith.constant 0 : i32
    return %c0_i32, %c0_i32_0 : i32, i32
  }
  func.func @transform_3(%arg0: i32) -> (i32, i32) {
    %c0_i32 = arith.constant 0 : i32
    %c0_i32_0 = arith.constant 0 : i32
    %c0_i32_1 = arith.constant 0 : i32
    return %c0_i32, %c0_i32_0 : i32, i32
  }
  func.func @transform_4(%arg0: i32) -> (i32, i32) {
    %c0_i32 = arith.constant 0 : i32
    %c0_i32_0 = arith.constant 0 : i32
    %c0_i32_1 = arith.constant 0 : i32
    return %c0_i32, %c0_i32_0 : i32, i32
  }
  func.func @transform_5(%arg0: i32) -> (i32, i32) {
    %c0_i32 = arith.constant 0 : i32
    %c0_i32_0 = arith.constant 0 : i32
    return %arg0, %c0_i32 : i32, i32
  }
}

</mosaic_0001>

<bundles_post_ra>
// kernel: pointwise_ffn.1
= control target key start
LH: loop header
LB: loop body
LE: loop exit
PB: predicated region body
PF: predicated region fallthrough
CT: control target
= control target key end

     0   :  { %v271_v1 = vmov 0.0   ;;  %vm272_vm0 = vmmov 0   ;;  %vm48_vm1 = vcmask 261120   ;;  %s351_s0 = inlined_call_operand.vmem [shape: f32[16,32], index: 0, kind: input, shape index: {}]   ;;  %s352_s1 = inlined_call_operand.vmem [shape: bf16[32,64], index: 1, kind: input, shape index: {}]   ;;  %s353_s2 = inlined_call_operand.vmem [shape: f32[1,64], index: 2, kind: input, shape index: {}]   ;;  %s354_s3 = inlined_call_operand.vmem [shape: bf16[64,32], index: 3, kind: input, shape index: {}]   ;;  %s355_s4 = inlined_call_operand.vmem [shape: f32[1,32], index: 4, kind: input, shape index: {}]   ;;  %s356_s5 = inlined_call_operand.hbm [shape: f32[16,32], index: 5, kind: output, shape index: {}]  }
   0x1   :  { %v241_v0 = vld [vmem:[%s352_s1] sm:$0xff]   ;;  %216 = vmatprep.subr.bf16.mxu0 %v271_v1  ;;  %v242_v2 = vld [vmem:[%s352_s1 + $0x8] sm:$0xff]   ;;  %224 = vmatprep.subr.bf16.mxu1 %v271_v1 }
   0x2   :  { %217 = vmatpush3.bf16.msra.mxu0 %v241_v0  ;;  %220 = vmatprep.mubr.msk.bf16.mxu0 %vm272_vm0, %v271_v1  ;;  %v22_v3 = vld [vmem:[%s351_s0] sm:$0xff]  ;;  %v23_v4 = vld [vmem:[%s351_s0 + $0x8] sm:$0xff] }
   0x3   :  { %218 = vmatprep.subr.bf16.mxu0 %v271_v1  ;;  %v243_v5 = vld [vmem:[%s354_s3] sm:$0xff]   ;;  %232 = vmatprep.mubr.msk.bf16.mxu1 %vm272_vm0, %v271_v1  ;;  %v244_v6 = vld [vmem:[%s354_s3 + $0x8] sm:$0xff]   ;;  %v24_v7 = vpack.c.bf16 %v23_v4, %v22_v3 }
   0x4   :  { %225 = vmatpush3.bf16.msra.mxu1 %v243_v5 }
   0x5   :  { %226 = vmatprep.subr.bf16.mxu1 %v271_v1 }
   0x6   :  { %219 = vmatpush3.bf16.msra.mxu0 %v242_v2 }
   0x7   :  { %10 = vsyncpa [#allocation3], 0  ;;  %v245_v8 = vld [vmem:[%s354_s3 + $0x10] sm:$0xff]   ;;  %v246_v9 = vld [vmem:[%s354_s3 + $0x18] sm:$0xff]   ;;  %vm135_vm2 = vcmask 523264   ;;  %s273_s3 = smov [#allocation2]  }
   0x8   :  { %227 = vmatpush3.bf16.msra.mxu1 %v244_v6  ;;  %v198_v10 = vld [vmem:[%s353_s2] ss:$0 sm:$0xff]  ;;  %s187_s11 = sshll.u32 %s273_s3, 4  ;;  %s188_s11 = int_to_ptr.vmem [resolvable:$true] %s187_s11 }
   0x9   :  { %221 = vmatmul.mubr.msk.bf16.vlgmr.msra.gmra.mrb[0].mxu0 %vm48_vm1, %v24_v7  ;;  %228 = vmatprep.subr.bf16.mxu1 %v271_v1  ;;  %v202_v20 = vld [vmem:[%s355_s4] ss:$0 sm:$0xff]  ;;  %s247_s2 = scalar_lea.vmem %s188_s11, 256  ;;  %p252_p1 = scmp.lt.s32.totalorder %s188_s11, %s188_s11 }
   0xa   :  { %p248_p0 = scmp.ne.s32.totalorder %s188_s11, %s247_s2  ;;  %p253_p2 = scmp.lt.s32.totalorder %s247_s2, %s247_s2 }
   0xc   :  { %229 = vmatpush3.bf16.msra.mxu1 %v245_v8  ;;  %p254_p3 = por %p253_p2, %p252_p1 }
   0xd   :  { %230 = vmatprep.subr.bf16.mxu1 %v271_v1 }
   0xe   :  { %p255_p4 = pnand %p254_p3, %p248_p0 }
  0x10   :  { %231 = vmatpush3.bf16.msra.mxu1 %v246_v9 }
  0xdc   :  { %v86_v11 = vpop.f32.mrb[0].mxu0 }
  0xdd   :  { %v87_v12 = vadd.f32 %v198_v10, %v86_v11  ;;  %v222_v13 = vpop.f32.mrb[1].mxu0 }
  0xde   :  { %v89_v14 = vpop.f32.mrb[2].mxu0 }
  0xdf   :  { %v90_v15 = vadd.f32 %v198_v10, %v89_v14  ;;  %v223_v16 = vpop.f32.mrb[3].mxu0  ;;  %v93_v17 = vmax.f32 %v87_v12, 0.0 }
  0xe1   :  { %v94_v18 = vmax.f32 %v90_v15, 0.0 }
  0xe3   :  { %v95_v19 = vpack.c.bf16 %v94_v18, %v93_v17 }
  0xe5   :  { %233 = vmatmul.mubr.msk.bf16.vlgmr.msra.gmra.mrb[0].mxu1 %vm135_vm2, %v95_v19 }
 0x1b8   :  { %v173_v21 = vpop.f32.mrb[0].mxu1 }
 0x1b9   :  { %v174_v22 = vadd.f32 %v202_v20, %v173_v21  ;;  %v234_v23 = vpop.f32.mrb[1].mxu1 }
 0x1ba   :  { %v176_v24 = vpop.f32.mrb[2].mxu1 }
 0x1bb   :  { %180 = vst.msk [vmem:[#allocation2] sm:$0xff] %vm48_vm1, %v174_v22  ;;  %v177_v25 = vadd.f32 %v202_v20, %v176_v24  ;;  %v235_v26 = vpop.f32.mrb[3].mxu1 }
 0x1bd   :  { %181 = vst.msk [vmem:[#allocation2 + $0x8] sm:$0xff] %vm48_vm1, %v177_v25 }
 0x1be   :  { %258 = shalt.err (!%p255_p4)
}
 0x1bf   :  { %s259_s13 = scalar_lea.hbm %s356_s5, 256 }
 0x1c0   :  { %p260_p5 = scmp.ne.s32.totalorder %s356_s5, %s259_s13  ;;  %p263_p6 = scmp.lt.u32.totalorder %s259_s13, %s356_s5 }
 0x1c2   :  { %p265_p7 = pnand %p263_p6, %p260_p5 }
 0x1c4   :  { %268 = shalt.err (!%p265_p7)
}
 0x1c5   :  { %s274_s18 = smov 128   ;;  %s275_s19 = smov 8  }
 0x1c6   :  { %193 = dma.vmem_to_hbm [thread:$0]  %s188_s11, 256, %s356_s5, [#allocation3], %s274_s18, %s274_s18, %s275_s19  }
 0x1c7   :  { %269 = dma.done.wait [#allocation3], 256  }
 0x1c8   :  { %270 = vsyncadd [#allocation3], 4294967040 }
 0x1c9   :  { %197 = vsyncpa [#allocation3], 1 }

</bundles_post_ra>
